<compile_context>
chip_gen: v6e
topology: v6e:2x2x1
jax: 0.10.0
libtpu: 0.0.40
codegen_flags: <defaults>
</compile_context>

<pallas_src>
import jax
import jax.numpy as jnp
from jax.experimental import pallas as pl
from jax.experimental.pallas import tpu as pltpu


def _round_up(x, m):
    return ((x + m - 1) // m) * m


def _make_ce_kernel(n_total, c_total, tile_n, tile_c):
    """Kernel closed over static sizes.  Per row block it emits one lane-dense
    (1, 1, 128) partial containing sum_r logsumexp(x[r, :])."""
    needs_c_mask = (c_total % tile_c) != 0
    needs_r_mask = (n_total % tile_n) != 0

    def kernel(logits_ref, out_ref, m_sc, l_sc):
        i = pl.program_id(0)               # row-block index   ("parallel")
        j = pl.program_id(1)               # class-block index ("arbitrary")
        last_j = pl.num_programs(1) - 1

        @pl.when(j == 0)
        def _():
            m_sc[...] = jnp.full_like(m_sc, -jnp.inf)
            l_sc[...] = jnp.zeros_like(l_sc)

        # Stream in the native dtype (bf16 halves HBM bytes); upcast once.
        x = logits_ref[...].astype(jnp.float32)          # (tile_n, tile_c)

        def update(xm):
            # Online logsumexp over the class axis (running max / scaled sum).
            # alpha is never exp(-inf - -inf): every class block has >= 1 valid
            # lane, so m_new is finite for valid rows; garbage padded rows are
            # neutralized by the row-mask select at finalize.
            m_prev = m_sc[...]
            m_new = jnp.maximum(m_prev, jnp.max(xm, axis=-1, keepdims=True))
            alpha = jnp.exp(m_prev - m_new)
            l_sc[...] = alpha * l_sc[...] + jnp.sum(jnp.exp(xm - m_new),
                                                    axis=-1, keepdims=True)
            m_sc[...] = m_new

        if needs_c_mask:
            # Only the final class block can have padded lanes: keep the iota /
            # compare / select out of the steady-state path.
            @pl.when(j != last_j)
            def _():
                update(x)

            @pl.when(j == last_j)
            def _():
                col = j * tile_c + jax.lax.broadcasted_iota(
                    jnp.int32, (tile_n, tile_c), 1)
                update(jnp.where(col < c_total, x, -jnp.inf))
        else:
            update(x)

        @pl.when(j == last_j)
        def _():
            per_row = m_sc[...] + jnp.log(l_sc[...])     # (tile_n, 1)
            if needs_r_mask:
                row = i * tile_n + jax.lax.broadcasted_iota(
                    jnp.int32, (tile_n, 1), 0)
                # select (NOT multiply): neutralizes garbage/NaN padded rows.
                per_row = jnp.where(row < n_total, per_row, 0.0)
            partial = jnp.sum(per_row)
            out_ref[...] = jnp.full(out_ref.shape, partial, dtype=out_ref.dtype)

    return kernel


_VMEM_BUDGET = 44 * 1024 * 1024   # modeled working set (keeps limit <= 48 MiB, v7x-safe)
_F32_TEMPS = 4                    # conservative count of full-tile f32 temporaries


def _choose_tiles(n, c, itemsize):
    # Class (lane) tile: single block up to 8192 classes (skips the online
    # rescale path for mid-size vocabularies); otherwise 4096-wide blocks
    # (>= 8 KiB contiguous per DMA'd row even for bf16).
    tile_c = c if c <= 8192 else 4096

    # Row tile from the VMEM model: 2x native input tile (double-buffered) plus
    # a few full-tile f32 temporaries inside the kernel body.
    bytes_per_row = tile_c * (2 * itemsize + _F32_TEMPS * 4)
    tile_n = max(8, min(1024, _VMEM_BUDGET // bytes_per_row))
    if tile_n >= n:
        if n > 8:
            # Guarantee >= 2 row blocks so the "parallel" axis shards across
            # both TensorCores on v7x.
            tile_n = min(n, _round_up(pl.cdiv(n, 2), 8))
            if tile_n >= n:
                tile_n = n
        else:
            tile_n = n                     # full extent: any small N allowed
    else:
        tile_n = (tile_n // 8) * 8         # strict multiple of 8 when tiled
    return tile_n, tile_c


def cross_entropy_loss(out, target, *, tile_n=None, tile_c=None):
    """Pallas equivalent of Cross_Entropy_Loss.forward.

    out:    (N, C) float logits (any float dtype; streamed in native precision)
    target: (N,)   integer class indices
    returns {'cross_entropy_loss': scalar float32}
    """
    n, c = out.shape
    itemsize = jnp.dtype(out.dtype).itemsize
    auto_n, auto_c = _choose_tiles(n, c, itemsize)
    tile_n = auto_n if tile_n is None else tile_n
    tile_c = auto_c if tile_c is None else tile_c

    grid = (pl.cdiv(n, tile_n), pl.cdiv(c, tile_c))
    n_row_blocks = grid[0]

    # Picked logit x[r, target[r]] gathered once here (tiny, O(N)) and
    # subtracted from the kernel's summed logsumexp -> hot loop is gather-free.
    idx = target.astype(jnp.int32).reshape(n, 1)
    picked = jnp.take_along_axis(out, idx, axis=1).astype(jnp.float32)

    kernel = _make_ce_kernel(n, c, tile_n, tile_c)

    # Scoped-VMEM limit derived from the same model used to size the tiles.
    # Explicit floor keeps v5e's 16 MiB default from strangling the pipeline;
    # the 48 MiB cap leaves headroom on v7x's 64 MiB physical VMEM.
    tile_bytes = tile_n * tile_c * itemsize
    f32_tile_bytes = tile_n * tile_c * 4
    vmem_need = 2 * tile_bytes + _F32_TEMPS * f32_tile_bytes + (2 << 20)
    vmem_limit = int(min(48 << 20, max(32 << 20, vmem_need)))

    partials = pl.pallas_call(
        kernel,
        out_shape=jax.ShapeDtypeStruct((n_row_blocks, 1, 128), jnp.float32),
        grid_spec=pltpu.PrefetchScalarGridSpec(
            num_scalar_prefetch=0,
            grid=grid,
            in_specs=[
                pl.BlockSpec((tile_n, tile_c), lambda i, j: (i, j)),
            ],
            out_specs=pl.BlockSpec((1, 1, 128), lambda i, j: (i, 0, 0)),
            scratch_shapes=[
                pltpu.VMEM((tile_n, 1), jnp.float32),   # running max m
                pltpu.VMEM((tile_n, 1), jnp.float32),   # running scaled sum l
            ],
        ),
        compiler_params=pltpu.CompilerParams(
            dimension_semantics=("parallel", "arbitrary"),
            vmem_limit_bytes=vmem_limit,
        ),
        cost_estimate=pl.CostEstimate(
            flops=3 * n * c,
            transcendentals=n * c,
            bytes_accessed=n * c * itemsize + n_row_blocks * 128 * 4,
        ),
    )(out)

    # Tiny final reduction in JAX: mean(lse_r - x[r, t_r]).
    loss = (jnp.sum(partials[:, 0, 0]) - jnp.sum(picked)) / jnp.float32(n)
    return {'cross_entropy_loss': loss}


if __name__ == "__main__":
    key = jax.random.PRNGKey(0)
    k_logits, k_target = jax.random.split(key)

    # Small, deliberately non-aligned shapes to exercise remainder handling.
    N, C = 20, 200
    logits = jax.random.normal(k_logits, (N, C), dtype=jnp.float32)
    target = jax.random.randint(k_target, (N,), 0, C, dtype=jnp.int32)

    # Pure-JAX reference.
    logp = jax.nn.log_softmax(logits, axis=-1)
    ref = -jnp.mean(jnp.take_along_axis(logp, target[:, None], axis=-1)[:, 0])

    # 1) Auto-tiled path: 2 row blocks (>=2 for v7x megacore), single class
    #    block, row-remainder mask in the last row block.
    res = cross_entropy_loss(logits, target)
    loss = jax.block_until_ready(res['cross_entropy_loss'])
    assert jnp.allclose(loss, ref, rtol=1e-5, atol=1e-5), (loss, ref)

    # 2) Explicit small tiles: grid (3, 2) — exercises last-class-block-only
    #    lane masking plus the multi-block online logsumexp path.
    res2 = cross_entropy_loss(logits, target, tile_n=8, tile_c=128)
    loss2 = jax.block_until_ready(res2['cross_entropy_loss'])
    assert jnp.allclose(loss2, ref, rtol=1e-5, atol=1e-5), (loss2, ref)

    # 3) bf16-streamed logits (halved HBM bytes), f32 accumulation in kernel.
    logits_bf16 = logits.astype(jnp.bfloat16)
    logp_bf16 = jax.nn.log_softmax(logits_bf16.astype(jnp.float32), axis=-1)
    ref_bf16 = -jnp.mean(
        jnp.take_along_axis(logp_bf16, target[:, None], axis=-1)[:, 0])
    res3 = cross_entropy_loss(logits_bf16, target)
    loss3 = jax.block_until_ready(res3['cross_entropy_loss'])
    assert jnp.allclose(loss3, ref_bf16, rtol=2e-2, atol=2e-2), (loss3, ref_bf16)

    print("KERNEL_OK")
</pallas_src>

<mosaic_0001>
module attributes {stable_mosaic.version = 11 : i64} {
  func.func @kernel(%arg0: i32, %arg1: i32, %arg2: memref<16x200xf32, #tpu.memory_space<vmem>>, %arg3: memref<1x1x128xf32, #tpu.memory_space<vmem>>, %arg4: memref<16x1xf32, #tpu.memory_space<vmem>>, %arg5: memref<16x1xf32, #tpu.memory_space<vmem>>) attributes {dimension_semantics = [#tpu.dimension_semantics<parallel>, #tpu.dimension_semantics<arbitrary>], iteration_bounds = array<i64: 2, 1>, scalar_prefetch = 0 : i64, scratch_operands = 2 : i64, tpu.core_type = #tpu.core_type<tc>, window_params = [{transform_indices = @transform_0, window_bounds = array<i64: 16, 200>}, {transform_indices = @transform_1, window_bounds = array<i64: 1, 1, 128>}]} {
    %c0_i32 = arith.constant 0 : i32
    %0 = arith.cmpi eq, %arg1, %c0_i32 : i32
    %1 = arith.extui %0 : i1 to i32
    %c0_i32_0 = arith.constant 0 : i32
    %2 = arith.cmpi ne, %1, %c0_i32_0 : i32
    scf.if %2 {
      %cst_13 = arith.constant 0xFF800000 : f32
      %23 = vector.broadcast %cst_13 : f32 to vector<16x1xf32>
      %c0_14 = arith.constant 0 : index
      %c0_15 = arith.constant 0 : index
      %24 = vector.load %arg4[%c0_14, %c0_15] : memref<16x1xf32, #tpu.memory_space<vmem>>, vector<16x1xf32>
      tpu.vector_store %arg4[%c0_14, %c0_15], %23 {strides = array<i32>} : memref<16x1xf32, #tpu.memory_space<vmem>>, vector<16x1xf32>,
      %cst_16 = arith.constant 0.000000e+00 : f32
      %25 = vector.broadcast %cst_16 : f32 to vector<16x1xf32>
      %c0_17 = arith.constant 0 : index
      %c0_18 = arith.constant 0 : index
      %26 = vector.load %arg5[%c0_17, %c0_18] : memref<16x1xf32, #tpu.memory_space<vmem>>, vector<16x1xf32>
      tpu.vector_store %arg5[%c0_17, %c0_18], %25 {strides = array<i32>} : memref<16x1xf32, #tpu.memory_space<vmem>>, vector<16x1xf32>,
    } else {
    }
    %c0 = arith.constant 0 : index
    %c0_1 = arith.constant 0 : index
    %3 = vector.load %arg2[%c0, %c0_1] : memref<16x200xf32, #tpu.memory_space<vmem>>, vector<16x200xf32>
    %c0_2 = arith.constant 0 : index
    %c0_3 = arith.constant 0 : index
    %4 = vector.load %arg4[%c0_2, %c0_3] : memref<16x1xf32, #tpu.memory_space<vmem>>, vector<16x1xf32>
    %cst = arith.constant dense<0xFF800000> : vector<16xf32>
    %5 = vector.multi_reduction <maximumf>, %3, %cst [1] : vector<16x200xf32> to vector<16xf32>
    %6 = vector.shape_cast %5 : vector<16xf32> to vector<16x1xf32>
    %7 = arith.maximumf %4, %6 : vector<16x1xf32>
    %8 = arith.subf %4, %7 : vector<16x1xf32>
    %9 = math.exp %8 : vector<16x1xf32>
    %c0_4 = arith.constant 0 : index
    %c0_5 = arith.constant 0 : index
    %10 = vector.load %arg5[%c0_4, %c0_5] : memref<16x1xf32, #tpu.memory_space<vmem>>, vector<16x1xf32>
    %11 = arith.mulf %9, %10 : vector<16x1xf32>
    %12 = vector.broadcast %7 : vector<16x1xf32> to vector<16x200xf32>
    %13 = arith.subf %3, %12 : vector<16x200xf32>
    %14 = math.exp %13 : vector<16x200xf32>
    %cst_6 = arith.constant dense<0.000000e+00> : vector<16xf32>
    %15 = vector.multi_reduction <add>, %14, %cst_6 [1] : vector<16x200xf32> to vector<16xf32>
    %16 = vector.shape_cast %15 : vector<16xf32> to vector<16x1xf32>
    %17 = arith.addf %11, %16 : vector<16x1xf32>
    %c0_7 = arith.constant 0 : index
    %c0_8 = arith.constant 0 : index
    %18 = vector.load %arg5[%c0_7, %c0_8] : memref<16x1xf32, #tpu.memory_space<vmem>>, vector<16x1xf32>
    tpu.vector_store %arg5[%c0_7, %c0_8], %17 {strides = array<i32>} : memref<16x1xf32, #tpu.memory_space<vmem>>, vector<16x1xf32>,
    %c0_9 = arith.constant 0 : index
    %c0_10 = arith.constant 0 : index
    %19 = vector.load %arg4[%c0_9, %c0_10] : memref<16x1xf32, #tpu.memory_space<vmem>>, vector<16x1xf32>
    tpu.vector_store %arg4[%c0_9, %c0_10], %7 {strides = array<i32>} : memref<16x1xf32, #tpu.memory_space<vmem>>, vector<16x1xf32>,
    %c0_i32_11 = arith.constant 0 : i32
    %20 = arith.cmpi eq, %arg1, %c0_i32_11 : i32
    %21 = arith.extui %20 : i1 to i32
    %c0_i32_12 = arith.constant 0 : i32
    %22 = arith.cmpi ne, %21, %c0_i32_12 : i32
    scf.if %22 {
      %c0_13 = arith.constant 0 : index
      %c0_14 = arith.constant 0 : index
      %23 = vector.load %arg4[%c0_13, %c0_14] : memref<16x1xf32, #tpu.memory_space<vmem>>, vector<16x1xf32>
      %c0_15 = arith.constant 0 : index
      %c0_16 = arith.constant 0 : index
      %24 = vector.load %arg5[%c0_15, %c0_16] : memref<16x1xf32, #tpu.memory_space<vmem>>, vector<16x1xf32>
      %25 = math.log %24 : vector<16x1xf32>
      %26 = arith.addf %23, %25 : vector<16x1xf32>
      %c16_i32 = arith.constant 16 : i32
      %27 = arith.muli %arg0, %c16_i32 : i32
      %28 = tpu.iota {dimensions = array<i32: 0>} : vector<16x1xi32>
      %29 = vector.broadcast %27 : i32 to vector<16x1xi32>
      %30 = arith.addi %29, %28 : vector<16x1xi32>
      %c20_i32 = arith.constant 20 : i32
      %31 = vector.broadcast %c20_i32 : i32 to vector<16x1xi32>
      %32 = arith.cmpi slt, %30, %31 : vector<16x1xi32>
      %cst_17 = arith.constant 0.000000e+00 : f32
      %33 = vector.broadcast %cst_17 : f32 to vector<16x1xf32>
      %34 = arith.select %32, %26, %33 : vector<16x1xi1>, vector<16x1xf32>
      %35 = vector.shape_cast %34 : vector<16x1xf32> to vector<1x16x1xf32>
      %cst_18 = arith.constant dense<0.000000e+00> : vector<1xf32>
      %36 = vector.multi_reduction <add>, %35, %cst_18 [1, 2] : vector<1x16x1xf32> to vector<1xf32>
      %37 = vector.shape_cast %36 : vector<1xf32> to vector<1x1x1xf32>
      %38 = vector.extract %37[0, 0, 0] : f32 from vector<1x1x1xf32>
      %39 = vector.broadcast %38 : f32 to vector<1x1x128xf32>
      %c0_19 = arith.constant 0 : index
      %c0_20 = arith.constant 0 : index
      %c0_21 = arith.constant 0 : index
      %40 = vector.load %arg3[%c0_19, %c0_20, %c0_21] : memref<1x1x128xf32, #tpu.memory_space<vmem>>, vector<1x1x128xf32>
      tpu.vector_store %arg3[%c0_19, %c0_20, %c0_21], %39 {strides = array<i32>} : memref<1x1x128xf32, #tpu.memory_space<vmem>>, vector<1x1x128xf32>,
    } else {
    }
    return
  }
  func.func @transform_0(%arg0: i32, %arg1: i32) -> (i32, i32) {
    %c0_i32 = arith.constant 0 : i32
    return %arg0, %arg1 : i32, i32
  }
  func.func @transform_1(%arg0: i32, %arg1: i32) -> (i32, i32, i32) {
    %c0_i32 = arith.constant 0 : i32
    %c0_i32_0 = arith.constant 0 : i32
    %c0_i32_1 = arith.constant 0 : i32
    return %arg0, %c0_i32, %c0_i32_0 : i32, i32, i32
  }
}

</mosaic_0001>

<bundles_post_ra>
// kernel: tpu_custom_call.1
= control target key start
LH: loop header
LB: loop body
LE: loop exit
PB: predicated region body
PF: predicated region fallthrough
CT: control target
= control target key end

     0   :  { %6 = vsyncpa [#allocation5], 0  ;;  %s768_s0 = inlined_call_operand.hbm [shape: f32[20,200], index: 0, kind: input, shape index: {}]   ;;  %s769_s1 = inlined_call_operand.hbm [shape: f32[2,1,128], index: 1, kind: output, shape index: {}]  }
   0x1   :  { %8 = vsyncpa [#allocation5 + $0x1], 0 }
   0x2   :  { %9 = vsyncpa [#allocation6], 0 }
   0x3   :  { %11 = vsyncpa [#allocation6 + $0x1], 0  ;;  %s594_s6 = smov 0   ;;  %s596_s7 = smov 0  }
   0x4   :  { %s598_s8 = smov 0   ;;  %s600_s9 = smov 0  }
   0x5   :  { %s602_s10 = smov 0   ;;  %s604_s11 = smov 0  }
   0x6 LB: > { %s366_s12 = sadd.s32 4294967295, %s575_s11   ;;  %s367_s13 = sadd.s32 4294967294, %s575_s11   ;;  %s575_s11 = sphi %s604_s11, %s17_s11   ;;  %s571_s10 = sphi %s602_s10, %s779_s10   ;;  %s567_s9 = sphi %s600_s9, %s778_s9   ;;  %s563_s8 = sphi %s598_s8, %s777_s8   ;;  %s559_s7 = sphi %s596_s7, %s776_s7   ;;  %s555_s6 = sphi %s594_s6, %s775_s6  }
   0x7   : > { %s29_s14 = sadd.s32 1, %s571_s10  ;;  %s38_s15 = sadd.s32 1, %s563_s8 }
   0x8   : > { %p31_p0 = scmp.ge.s32.totalorder %s29_s14, 2  ;;  %p45_p1 = scmp.ne.s32.totalorder %s563_s8, %s559_s7 }
   0x9   : > { %p46_p2 = scmp.eq.s32.totalorder %s575_s11, 0  ;;  %p51_p3 = scmp.ne.s32.totalorder %s559_s7, %s555_s6 }
   0xa   : > { %s781_s14 = smov (%p31_p0, %s29_s14), 0  ;;  %p52_p5 = scmp.eq.s32.totalorder %s366_s12, 0 }
   0xb   : > { %p47_p4 = por %p46_p2, %p45_p1  ;;  %s33_s16 = ssub.s32 %s571_s10, %s781_s14 }
   0xc   : > { %p75_p6 = scmp.eq.s32.totalorder %s366_s12, 1  ;;  %p36_p7 = scmp.eq.s32.totalorder %s33_s16, 0 }
   0xd   : > { %p637_p8 = por %p52_p5, %p51_p3  ;;  %p81_p10 = scmp.eq.s32.totalorder %s367_s13, 1 }
   0xe   : > { %p641_p9 = por %p75_p6, %p45_p1  ;;  %p770_p12 = scmp.ge.s32.totalorder %s575_s11, 2 }
   0xf   : > { %s646_s19 = scalar_select %p36_p7, %s563_s8, %s38_s15  }
  0x10   : > { %p648_p11 = por %p81_p10, %p51_p3  ;;  %97 = sbr.rel (%p770_p12) target bundleno = 53 (0x35), region = 16 }
  0x15   : > { %100 = sbr.rel (!%p47_p4) target bundleno = 53 (0x35), region = 20  ;;  %s101_s21 = sand.u32 (%p47_p4), 1, %s563_s8  }
  0x16   : > { %s371_s22 = sshll.u32 (%p47_p4), %s571_s10, 1  ;;  %s370_s23 = sshll.u32 (%p47_p4), %s101_s21, 5 }
  0x17   : > { %s108_s24 = ssub.s32 (%p47_p4), 3, %s371_s22  ;;  %s660_s27 = scalar_lea.sflag (%p47_p4), [#allocation5], %s101_s21 }
  0x18   : > { %p109_p13 = scmp.lt.s32.totalorder (%p47_p4), %s108_s24, 2  ;;  %s105_s28 = scalar_lea.vmem (%p47_p4), [#allocation4], %s370_s23 }
  0x1a   : > { %s783_s24 = smov (!%p109_p13, %s108_s24), 2 }
  0x1b   : > { %s657_s25 = sshll.u32 %s783_s24, 8 }
  0x1c   : > { %s114_s26 = ssub.s32 512, %s657_s25 }
  0x1d   : > { %115 = vsyncadd %s660_s27, %s114_s26  ;;  %p374_p0 = scmp.ne.s32.totalorder %s657_s25, 0  ;;  %s387_s29 = sshll.u32 %s571_s10, 9 }
  0x1e   : > { %s668_s3 = scalar_lea.hbm %s768_s0, %s387_s29  ;;  %s122_s4 = sshll.u32 %s105_s28, 4  ;;  %s670_s4 = int_to_ptr.vmem [resolvable:$true] %s122_s4 }
  0x1f   : > { %s469_s5 = scalar_lea.hbm %s668_s3, %s657_s25  ;;  %s473_s15 = scalar_lea.hbm %s768_s0, 768 }
  0x20   : > { %p470_p1 = scmp.ne.s32.totalorder %s668_s3, %s469_s5  ;;  %p475_p4 = scmp.lt.s32.totalorder %s473_s15, %s469_s5 }
  0x22   : > { %p471_p2 = pnand %p470_p1, %p374_p0 }
  0x24   : > { %p472_p3 = pneg %p471_p2 }
  0x26   : > { %p477_p5 = pnand %p475_p4, %p472_p3 }
  0x28   : > { %480 = shalt.err (!%p477_p5)
}
  0x29   : > { %s481_s16 = scalar_lea.vmem %s670_s4, %s657_s25  ;;  %s577_s21 = smov [#allocation4]  }
  0x2a   : > { %p482_p6 = scmp.ne.s32.totalorder %s670_s4, %s481_s16  ;;  %s485_s22 = sshll.u32 %s577_s21, 4  ;;  %s486_s22 = int_to_ptr.vmem [resolvable:$false] %s485_s22 }
  0x2b   : > { %s487_s23 = scalar_lea.vmem %s486_s22, 1024  ;;  %p488_p13 = scmp.lt.s32.totalorder %s670_s4, %s486_s22 }
  0x2c   : > { %p483_p7 = pnand %p482_p6, %p374_p0  ;;  %p489_p1 = scmp.lt.s32.totalorder %s487_s23, %s481_s16 }
  0x2e   : > { %p484_p10 = pneg %p483_p7  ;;  %p490_p2 = por %p489_p1, %p488_p13 }
  0x30   : > { %p491_p12 = pnand %p490_p2, %p484_p10 }
  0x32   : > { %494 = shalt.err (!%p491_p12)
}
  0x33   : > { %s578_s24 = smov 256   ;;  %s579_s26 = smov 16  }
  0x34   : > { %128 = dma.hbm_to_vmem [thread:$0]  (%p374_p0), %s668_s3, %s657_s25, %s670_s4, %s660_s27, %s578_s24, %s578_s24, %s579_s26  }
  0x35 PF: > { %p379_p3 = scmp.ge.s32.totalorder %s575_s11, 1  ;;  %p130_p4 = scmp.lt.s32.totalorder %s575_s11, 3 }
  0x37   : > { %p131_p5 = pnand %p379_p3, %p130_p4 }
  0x38   : > { %s695_s28 = sand.u32 (!%p131_p5), 1, %s559_s7  }
  0x39   : > { %134 = sbr.rel (%p131_p5) target bundleno = 741 (0x2e5), region = 24  ;;  %s380_s29 = sshll.u32 (!%p131_p5), %s695_s28, 5 }
  0x3a   : > { %s137_s30 = scalar_lea.sflag (!%p131_p5), [#allocation5], %s695_s28  ;;  %s140_s2 = scalar_lea.vmem (!%p131_p5), [#allocation4], %s380_s29 }
  0x3e   : > { %546 = dma.done.wait (%p637_p8), %s137_s30, 512  }
  0x3f   : > { %548 = vsyncadd (%p637_p8), %s137_s30, 4294966784  ;;  %vm169_vm0 = vcmask 7168   ;;  %v580_v0 = vmov -inf   ;;  %vm180_vm1 = vcmask 588800   ;;  %v174_v1 = vld [vmem:[%s140_s2] sm:$0xff]  ;;  %v175_v2 = vld [vmem:[%s140_s2 + $0x8] sm:$0xff]  ;;  %v252_v51 = vlaneseq }
  0x40   : > { %170 = vst.msk [vmem:[#allocation2] sm:$0xff] %vm169_vm0, %v580_v0  ;;  %171 = vst.msk [vmem:[#allocation2 + $0x8] sm:$0xff] %vm169_vm0, %v580_v0  ;;  %v181_v3 = vsel %vm180_vm1, %v175_v2, -inf  ;;  %v176_v4 = vld [vmem:[%s140_s2 + $0x10] sm:$0xff]  ;;  %v177_v5 = vld [vmem:[%s140_s2 + $0x18] sm:$0xff]  ;;  %v581_v9 = vmov 0  }
  0x41   : > { %v182_v6 = vmax.f32 %v174_v1, %v181_v3  ;;  %v185_v7 = vsel %vm180_vm1, %v177_v5, -inf  ;;  %451 = vset.pattern.permute.xlu1 %v581_v9  ;;  %452 = vset.pattern.permute.xlu0 %v581_v9  ;;  %v582_v10 = vmov 0.0   ;;  %s381_s17 = sshll.u32 %s567_s9, 4  ;;  %v253_v52 = vshrl.u32 %v252_v51, 7  ;;  %s157_s25 = scalar_lea.vmem [#allocation7], %s695_s28 }
  0x42   : > { %v186_v8 = vmax.f32 %v176_v4, %v185_v7  ;;  %172 = vst.msk [vmem:[#allocation3] sm:$0xff] %vm169_vm0, %v582_v10  ;;  %173 = vst.msk [vmem:[#allocation3 + $0x8] sm:$0xff] %vm169_vm0, %v582_v10  ;;  %v255_v53 = vstv %s381_s17  ;;  %s289_s27 = sshll.u32 %s157_s25, 4  ;;  %s287_s12 = scalar_lea.hbm %s769_s1, %s381_s17  ;;  %s721_s27 = int_to_ptr.vmem [resolvable:$true] %s289_s27 }
  0x43   : > { %183 = vmax.xlane.f32.xlu0 %v182_v6  ;;  %v254_v54 = vadd.s32 8, %v253_v52  ;;  %v256_v56 = vadd.s32 %v255_v53, %v253_v52  ;;  %s277_s13 = scalar_lea.sflag [#allocation6], %s695_s28  ;;  %s495_s15 = scalar_lea.vmem %s721_s27, 16 }
  0x44   : > { %p496_p8 = scmp.ne.s32.totalorder %s721_s27, %s495_s15  ;;  %s583_s16 = smov [#allocation7]  }
  0x45   : > { %v257_v59 = vadd.s32 %v255_v53, %v254_v54  ;;  %vm258_vm2 = vcmp.lt.s32.totalorder %v256_v56, 20  ;;  %s499_s21 = sshll.u32 %s583_s16, 4  ;;  %s500_s21 = int_to_ptr.vmem [resolvable:$false] %s499_s21 }
  0x46   : > { %p497_p12 = pnand %p496_p8, %p641_p9  ;;  %s501_s22 = scalar_lea.vmem %s500_s21, 32 }
  0x47   : > { %187 = vmax.xlane.f32.xlu0 %v186_v8  ;;  %v178_v11 = vld [vmem:[#allocation2] sm:$0xff]  ;;  %v179_v14 = vld [vmem:[#allocation2 + $0x8] sm:$0xff]  ;;  %vm259_vm3 = vcmp.lt.s32.totalorder %v257_v59, 20  ;;  %p502_p6 = scmp.lt.s32.totalorder %s721_s27, %s500_s21  ;;  %p503_p7 = scmp.lt.s32.totalorder %s501_s22, %s495_s15 }
  0x48   : > { %p498_p0 = pneg %p497_p12 }
  0x49   : > { %v197_v40 = vld [vmem:[#allocation3] sm:$0xff]  ;;  %v198_v44 = vld [vmem:[#allocation3 + $0x8] sm:$0xff]  ;;  %p504_p10 = por %p503_p7, %p502_p6 }
  0x4b   : > { %p505_p13 = pnand %p504_p10, %p498_p0 }
  0xcc   : > { %v184_v12 = vpop.xlane.xlu0 %183 }
  0xcd   : > { %v189_v13 = vmax.f32 %v178_v11, %v184_v12 }
  0xcf   : > { %v191_v15 = vsub.f32 %v178_v11, %v189_v13  ;;  %236 = vst.msk [vmem:[#allocation2] sm:$0xff] %vm169_vm0, %v189_v13  ;;  %203 = vperm.xlu1 %451, %v189_v13  }
  0xd0   : > { %v188_v16 = vpop.xlane.xlu0 %187 }
  0xd1   : > { %v190_v17 = vmax.f32 %v179_v14, %v188_v16  ;;  %v193_v37 = vmul.f32 1.442695, %v191_v15 }
  0xd3   : > { %v192_v18 = vsub.f32 %v179_v14, %v190_v17  ;;  %237 = vst.msk [vmem:[#allocation2 + $0x8] sm:$0xff] %vm169_vm0, %v190_v17  ;;  %208 = vperm.xlu1 %451, %v190_v17  }
  0xd5   : > { %v195_v38 = vmul.f32 1.442695, %v192_v18 }
  0xd6   : > { %v241_v58 = vld [vmem:[#allocation2] sm:$0xff] }
  0xda   : > { %v242_v63 = vld [vmem:[#allocation2 + $0x8] sm:$0xff] }
 0x14a   : > { %v204_v19 = vpop.permute.xlu1 %203 }
 0x14b   : > { %v211_v20 = vsub.f32 %v174_v1, %v204_v19  ;;  %v212_v21 = vsub.f32 %v175_v2, %v204_v19 }
 0x14d   : > { %v215_v22 = vmul.f32 1.442695, %v211_v20  ;;  %v217_v23 = vmul.f32 1.442695, %v212_v21 }
 0x14e   : > { %v209_v24 = vpop.permute.xlu1 %208 }
 0x14f   : > { %453 = vpow2.f32 %v215_v22  ;;  %v213_v25 = vsub.f32 %v176_v4, %v209_v24  ;;  %v214_v26 = vsub.f32 %v177_v5, %v209_v24 }
 0x150   : > { %455 = vpow2.f32 %v217_v23 }
 0x151   : > { %v219_v27 = vmul.f32 1.442695, %v213_v25  ;;  %v221_v28 = vmul.f32 1.442695, %v214_v26 }
 0x153   : > { %457 = vpow2.f32 %v219_v27 }
 0x154   : > { %459 = vpow2.f32 %v221_v28 }
 0x155   : > { %461 = vpow2.f32 %v193_v37 }
 0x156   : > { %463 = vpow2.f32 %v195_v38 }
 0x15c   : > { %v454_v29 = vpop.eup %453 }
 0x15d   : > { %v456_v30 = vpop.eup %455 }
 0x15e   : > { %v223_v31 = vsel %vm180_vm1, %v456_v30, 0.0 }
 0x15f   : > { %v224_v32 = vadd.f32 %v454_v29, %v223_v31 }
 0x160   : > { %v458_v33 = vpop.eup %457 }
 0x161   : > { %v460_v34 = vpop.eup %459  ;;  %225 = vadd.xlane.f32.xlu0 %v224_v32 }
 0x162   : > { %v227_v35 = vsel %vm180_vm1, %v460_v34, 0.0  ;;  %v462_v39 = vpop.eup %461 }
 0x163   : > { %v228_v36 = vadd.f32 %v458_v33, %v227_v35  ;;  %v199_v41 = vmul.f32 %v462_v39, %v197_v40  ;;  %v464_v42 = vpop.eup %463 }
 0x164   : > { %v200_v46 = vmul.f32 %v464_v42, %v198_v44 }
 0x165   : > { %229 = vadd.xlane.f32.xlu1 %v228_v36 }
 0x1ea   : > { %v226_v43 = vpop.xlane.xlu0 %225 }
 0x1eb   : > { %v231_v45 = vadd.f32 %v226_v43, %v199_v41 }
 0x1ed   : > { %234 = vst.msk [vmem:[#allocation3] sm:$0xff] %vm169_vm0, %v231_v45 }
 0x1ee   : > { %v230_v47 = vpop.xlane.xlu1 %229 }
 0x1ef   : > { %v232_v48 = vadd.f32 %v230_v47, %v200_v46 }
 0x1f1   : > { %235 = vst.msk [vmem:[#allocation3 + $0x8] sm:$0xff] %vm169_vm0, %v232_v48 }
 0x1f4   : > { %v243_v49 = vld [vmem:[#allocation3] sm:$0xff] }
 0x1f5   : > { %465 = vlog2.f32 %v243_v49 }
 0x1f8   : > { %v244_v50 = vld [vmem:[#allocation3 + $0x8] sm:$0xff] }
 0x1f9   : > { %467 = vlog2.f32 %v244_v50 }
 0x202   : > { %v466_v55 = vpop.eup %465 }
 0x203   : > { %v246_v57 = vmul.f32 0.6931472, %v466_v55 }
 0x205   : > { %v249_v60 = vadd.f32 %v246_v57, %v241_v58 }
 0x206   : > { %v468_v61 = vpop.eup %467 }
 0x207   : > { %v248_v62 = vmul.f32 0.6931472, %v468_v61  ;;  %v260_v1 = vsel %vm258_vm2, %v249_v60, 0.0 }
 0x208   : > { %v262_v3 = vsel %vm169_vm0, %v260_v1, 0.0 }
 0x209   : > { %v250_v0 = vadd.f32 %v248_v62, %v242_v63 }
 0x20b   : > { %v261_v2 = vsel %vm259_vm3, %v250_v0, 0.0 }
 0x20c   : > { %v263_v4 = vsel %vm169_vm0, %v261_v2, 0.0 }
 0x20d   : > { %v264_v5 = vadd.f32 %v263_v4, %v262_v3 }
 0x20f   : > { %265 = vadd.xlane.f32.xlu0 %v264_v5 }
 0x298   : > { %v266_v6 = vpop.xlane.xlu0 %265 }
 0x299   : > { %v267_v7 = vrot.slane %v266_v6, 4 }
 0x29b   : > { %v268_v8 = vadd.f32 %v267_v7, %v266_v6 }
 0x29d   : > { %v269_v9 = vrot.slane %v268_v8, 2 }
 0x29f   : > { %v270_v10 = vadd.f32 %v269_v9, %v268_v8 }
 0x2a1   : > { %v271_v11 = vrot.slane %v270_v10, 1 }
 0x2a3   : > { %v272_v12 = vadd.f32 %v271_v11, %v270_v10 }
 0x2a5   : > { %388 = vpush %v272_v12 }
 0x2d6   : > { %s389_s3 = spop %388 }
 0x2d7   : > { %v274_v13 = vstv %s389_s3 }
 0x2d8   : > { %275 = vst [vmem:[%s157_s25] sm:$0x1] %v274_v13 }
 0x2d9   : > { %508 = shalt.err (!%p505_p13)
}
 0x2da   : > { %s509_s9 = scalar_lea.hbm %s287_s12, 16  ;;  %s513_s26 = scalar_lea.hbm %s769_s1, 32 }
 0x2db   : > { %p510_p1 = scmp.ne.s32.totalorder %s287_s12, %s509_s9  ;;  %p514_p4 = scmp.lt.s32.totalorder %s287_s12, %s769_s1 }
 0x2dc   : > { %p515_p5 = scmp.lt.s32.totalorder %s513_s26, %s509_s9 }
 0x2dd   : > { %p511_p2 = pnand %p510_p1, %p641_p9 }
 0x2de   : > { %p516_p8 = por %p515_p5, %p514_p4 }
 0x2df   : > { %p512_p3 = pneg %p511_p2 }
 0x2e1   : > { %p517_p12 = pnand %p516_p8, %p512_p3 }
 0x2e3   : > { %520 = shalt.err (!%p517_p12)
}
 0x2e4   : > { %391 = dma.vmem_to_hbm [thread:$0]  (%p641_p9), %s721_s27, 16, %s287_s12, %s277_s13  }
 0x2e5 PF: > { %s301_s30 = sand.u32 1, %s555_s6   ;;  %p774_p0 = scmp.ge.s32.totalorder %s575_s11, 2 }
 0x2e6   : > { %s302_s2 = scalar_lea.sflag [#allocation6], %s301_s30 }
 0x2e7   : > { %p394_p6 = pnand %p774_p0, %p648_p11 }
 0x2e9   : > { %p395_p7 = pneg %p394_p6 }
 0x2eb   : > { %550 = dma.done.wait (%p395_p7), %s302_s2, 16  }
 0x2ec   : > { %552 = vsyncadd (%p395_p7), %s302_s2, 4294967280  ;;  %s17_s11 = sadd.s32 1, %s575_s11   ;;  %s775_s6 = smov %s559_s7 }
 0x2ed   : > { %p14_p10 = scmp.ge.s32.totalorder %s17_s11, 4   ;;  %s776_s7 = smov %s563_s8 }
 0x2ee   : > { %s777_s8 = smov %s646_s19  ;;  %s778_s9 = smov %s571_s10 }
 0x2ef   : > { %s779_s10 = smov %s781_s14  ;;  %16 = sbr.rel (!%p14_p10) target bundleno = 6 (0x6), region = 77 }
 0x2f4   :  { %306 = vsyncpa [#allocation5], 1 }
 0x2f5   :  { %308 = vsyncpa [#allocation5 + $0x1], 1 }
 0x2f6   :  { %309 = vsyncpa [#allocation6], 1 }
 0x2f7   :  { %311 = vsyncpa [#allocation6 + $0x1], 1 }

</bundles_post_ra>
